<compile_context>
chip_gen: v5e
topology: v5e:2x2
jax: 0.10.0
libtpu: 0.0.40
codegen_flags: <defaults>
</compile_context>

<pallas_src>
import functools

import jax
import jax.numpy as jnp
from jax.experimental import pallas as pl
from jax.experimental.pallas import tpu as pltpu

_LANE = 128
_TARGET_BLOCK_BYTES = 1 << 20  # ~1 MiB per block -> ~4 MiB VMEM with 2x double-buffering


def _identity_copy_kernel(x_ref, o_ref):
    o_ref[...] = x_ref[...]


def _identity_copy_2d(x2d, tile_rows):
    """Identity-copy a (rows, cols) lane-dense view through a Pallas kernel."""
    rows, cols = x2d.shape
    grid = (pl.cdiv(rows, tile_rows),)  # ragged tail block handled by Pallas masking
    return pl.pallas_call(
        _identity_copy_kernel,
        out_shape=jax.ShapeDtypeStruct((rows, cols), x2d.dtype),
        grid=grid,
        in_specs=[pl.BlockSpec((tile_rows, cols), lambda i: (i, 0))],
        out_specs=pl.BlockSpec((tile_rows, cols), lambda i: (i, 0)),
        compiler_params=pltpu.CompilerParams(
            dimension_semantics=("parallel",),   # megacore sharding on v7x
            vmem_limit_bytes=32 * 1024 * 1024,   # explicit headroom (v5e default is 16 MiB)
        ),
    )(x2d)


def _resolve_view_shape(shape, total):
    """torch.view shape resolution with proper divisibility checks."""
    shape = list(shape)
    neg = [i for i, s in enumerate(shape) if s == -1]
    if len(neg) > 1:
        raise ValueError("view: only one dimension may be -1")
    if neg:
        known = 1
        for s in shape:
            if s != -1:
                known *= int(s)
        if known == 0 or total % known != 0:
            raise ValueError(f"view: cannot reshape {total} elements into {tuple(shape)}")
        shape[neg[0]] = total // known
    else:
        known = 1
        for s in shape:
            known *= int(s)
        if known != total:
            raise ValueError(f"view: cannot reshape {total} elements into {tuple(shape)}")
    return tuple(int(s) for s in shape)


@functools.partial(jax.jit, static_argnums=(1,))
def _reshape_forward(x, shape):
    total = x.size

    # Non-lane-aligned flat length: a Pallas copy would need pad/strip passes
    # (extra HBM traffic) for zero benefit — emit the metadata-only reshape.
    if total % _LANE != 0:
        return jnp.reshape(x, shape)

    # Lane-dense 2-D view of the row-major flat buffer: wide last dim ->
    # fewer, larger, fully unmasked vst/DMA descriptors.
    cols = _LANE
    for cand in (1024, 512, 256):
        if total % cand == 0:
            cols = cand
            break
    rows = total // cols

    # dtype-aware sublane multiple (bf16 packs 2 rows/sublane, int8/fp8 pack 4).
    itemsize = x.dtype.itemsize
    sub = {4: 8, 2: 16, 1: 32}.get(itemsize, 8)

    # Fixed ~1 MiB block, independent of divisibility (cdiv grid masks the tail).
    rows_target = max(sub, (_TARGET_BLOCK_BYTES // (cols * itemsize)) // sub * sub)
    tile_rows = rows if rows <= rows_target else rows_target

    x2d = jnp.reshape(x, (rows, cols))          # metadata-only under jit
    out2d = _identity_copy_2d(x2d, tile_rows)   # single read+write HBM pass
    return jnp.reshape(out2d, shape)            # metadata-only under jit


class Reshape:
    """JAX/Pallas equivalent of the PyTorch Reshape(nn.Module): x.view(shape)."""

    def __init__(self, *args):
        self.shape = args

    def __call__(self, x):
        shape = _resolve_view_shape(self.shape, x.size)
        return _reshape_forward(x, shape)


if __name__ == "__main__":
    key = jax.random.PRNGKey(0)
    # Small NCHW-style input: batch=2, channels=4, spatial=16x16.
    x = jax.random.normal(key, (2, 4, 16, 16), dtype=jnp.float32)

    # Typical "flatten per-batch" use of this module.
    reshape_mod = Reshape(2, -1)
    y = jax.block_until_ready(reshape_mod(x))

    # Correctness check against plain row-major reshape (== torch .view).
    ref = jnp.reshape(x, (2, -1))
    assert y.shape == (2, 4 * 16 * 16)
    assert y.dtype == x.dtype
    assert bool(jnp.all(y == ref))

    print("KERNEL_OK")
</pallas_src>

<mosaic_0001>
module attributes {stable_mosaic.version = 11 : i64} {
  func.func @_identity_copy_kernel(%arg0: i32, %arg1: memref<2x1024xf32, #tpu.memory_space<vmem>>, %arg2: memref<2x1024xf32, #tpu.memory_space<vmem>>) attributes {dimension_semantics = [#tpu.dimension_semantics<parallel>], iteration_bounds = array<i64: 1>, scalar_prefetch = 0 : i64, scratch_operands = 0 : i64, tpu.core_type = #tpu.core_type<tc>, window_params = [{transform_indices = @transform_0, window_bounds = array<i64: 2, 1024>}, {transform_indices = @transform_1, window_bounds = array<i64: 2, 1024>}]} {
    %c0 = arith.constant 0 : index
    %c0_0 = arith.constant 0 : index
    %0 = vector.load %arg1[%c0, %c0_0] : memref<2x1024xf32, #tpu.memory_space<vmem>>, vector<2x1024xf32>
    %c0_1 = arith.constant 0 : index
    %c0_2 = arith.constant 0 : index
    %1 = vector.load %arg2[%c0_1, %c0_2] : memref<2x1024xf32, #tpu.memory_space<vmem>>, vector<2x1024xf32>
    tpu.vector_store %arg2[%c0_1, %c0_2], %0 {strides = array<i32>} : memref<2x1024xf32, #tpu.memory_space<vmem>>, vector<2x1024xf32>,
    return
  }
  func.func @transform_0(%arg0: i32) -> (i32, i32) {
    %c0_i32 = arith.constant 0 : i32
    %c0_i32_0 = arith.constant 0 : i32
    return %arg0, %c0_i32 : i32, i32
  }
  func.func @transform_1(%arg0: i32) -> (i32, i32) {
    %c0_i32 = arith.constant 0 : i32
    %c0_i32_0 = arith.constant 0 : i32
    return %arg0, %c0_i32 : i32, i32
  }
}

</mosaic_0001>

<bundles_post_ra>
// kernel: _reshape_forward.1
= control target key start
LH: loop header
LB: loop body
LE: loop exit
PB: predicated region body
PF: predicated region fallthrough
CT: control target
= control target key end

     0   :  { %s76_s0 = inlined_call_operand.vmem [shape: f32[2,1024], index: 0, kind: input, shape index: {}]   ;;  %s77_s1 = inlined_call_operand.hbm [shape: f32[2,1024], index: 1, kind: output, shape index: {}]  }
   0x1   :  { %v9_v0 = vld [vmem:[%s76_s0] sm:$0xff]  ;;  %v10_v1 = vld [vmem:[%s76_s0 + $0x8] sm:$0xff] }
   0x2   :  { %6 = vsyncpa [#allocation3], 0  ;;  %s20_s12 = sshll.u32 %s77_s1, 4  ;;  %11 = vst [vmem:[#allocation2] sm:$0xff] %v9_v0  ;;  %s56_s13 = smov [#allocation2]   ;;  %s21_s12 = int_to_ptr.hbm [resolvable:$true] %s20_s12 }
   0x3   :  { %s18_s14 = sshll.u32 %s56_s13, 4  ;;  %12 = vst [vmem:[#allocation2 + $0x8] sm:$0xff] %v10_v1  ;;  %s19_s14 = int_to_ptr.vmem [resolvable:$true] %s18_s14 }
   0x4   :  { %23 = dma.vmem_to_hbm [thread:$0]  %s19_s14, 256, %s21_s12, [#allocation3]  }
   0x5   :  { %54 = dma.done.wait [#allocation3], 256  }
   0x6   :  { %55 = vsyncadd [#allocation3], 4294967040 }
   0x7   :  { %28 = vsyncpa [#allocation3], 1 }

</bundles_post_ra>
